<compile_context>
chip_gen: v5e
topology: v5e:2x2
jax: 0.10.0
libtpu: 0.0.40
codegen_flags: <defaults>
</compile_context>

<pallas_src>
import functools

import jax
import jax.numpy as jnp
from jax.experimental import pallas as pl
from jax.experimental.pallas import tpu as pltpu

SKIP = 0.1  # opt.skip (config scalar baked into the kernel)


def _skip_conv_kernel(p_ref, w_ref, b_ref, out_ref, lat_ref, *, skip, c):
    """One batch element per grid step.

    p_ref:   (1, 9*C, H*W)  im2col patches, tap-major ordering (dy, dx, cin)
    w_ref:   (C, 9*C)       conv weights matching the tap ordering
    b_ref:   (C, 1)         conv bias
    out_ref: (1, C, H*W)    skip * x + latent
    lat_ref: (1, C, H*W)    latent = conv(x)
    """
    patches = p_ref[0]                                     # (9C, HW), loaded once
    # Whole 3x3 conv as a single MXU matmul: (C, 9C) x (9C, HW) -> (C, HW).
    lat = jnp.dot(w_ref[...], patches,
                  preferred_element_type=jnp.float32)
    lat = lat + b_ref[...]                                 # (C,1) broadcast over lanes
    lat_ref[0] = lat.astype(lat_ref.dtype)
    # Skip path: centre tap of the im2col block IS x (no second input stream).
    x_center = patches[4 * c:5 * c, :].astype(jnp.float32)
    out_ref[0] = (skip * x_center + lat).astype(out_ref.dtype)


def skip_module_forward(x_nchw, w, b, *, skip=SKIP):
    """Pallas implementation of SkipModule.forward.

    Args:
      x_nchw: (N, C, H, W) float32 input (PyTorch layout).
      w:      (Cout, Cin, 3, 3) conv weight (PyTorch layout).
      b:      (Cout,) conv bias.
    Returns:
      (skip * x + latent, latent), both (N, C, H, W).
    """
    N, C, H, W = x_nchw.shape
    HW = H * W

    # Glue (pure JAX): zero-pad + im2col, all in NCHW; reshapes are layout-free.
    x_pad = jnp.pad(x_nchw, ((0, 0), (0, 0), (1, 1), (1, 1)))
    taps = [x_pad[:, :, dy:dy + H, dx:dx + W]
            for dy in range(3) for dx in range(3)]          # 9 x (N, C, H, W)
    patches = jnp.stack(taps, axis=1).reshape(N, 9 * C, HW)  # (N, 9C, HW)

    # (Cout, Cin, kh, kw) -> (Cout, kh, kw, Cin) -> (C, 9C); matches tap order.
    w_mat = jnp.transpose(w, (0, 2, 3, 1)).reshape(C, 9 * C)
    b2d = b.reshape(C, 1).astype(jnp.float32)

    kernel = functools.partial(_skip_conv_kernel, skip=float(skip), c=C)

    out_f, lat_f = pl.pallas_call(
        kernel,
        out_shape=(
            jax.ShapeDtypeStruct((N, C, HW), x_nchw.dtype),
            jax.ShapeDtypeStruct((N, C, HW), x_nchw.dtype),
        ),
        grid=(N,),
        in_specs=[
            pl.BlockSpec((1, 9 * C, HW), lambda n: (n, 0, 0)),
            pl.BlockSpec((C, 9 * C), lambda n: (0, 0)),
            pl.BlockSpec((C, 1), lambda n: (0, 0)),
        ],
        out_specs=(
            pl.BlockSpec((1, C, HW), lambda n: (n, 0, 0)),
            pl.BlockSpec((1, C, HW), lambda n: (n, 0, 0)),
        ),
        compiler_params=pltpu.CompilerParams(
            dimension_semantics=("parallel",)),
    )(patches, w_mat, b2d)

    # Free reshapes back to NCHW (no transposes).
    return out_f.reshape(N, C, H, W), lat_f.reshape(N, C, H, W)


def _reference(x_nchw, w, b, *, skip=SKIP):
    """Pure-JAX reference (matches PyTorch Conv2d(..., padding=1) + SkipModule)."""
    latent = jax.lax.conv_general_dilated(
        x_nchw, w, window_strides=(1, 1), padding="SAME",
        dimension_numbers=("NCHW", "OIHW", "NCHW"))
    latent = latent + b.reshape(1, -1, 1, 1)
    return skip * x_nchw + latent, latent


if __name__ == "__main__":
    N, C, H, W = 2, 4, 16, 16

    key = jax.random.PRNGKey(0)
    kx, kw, kb = jax.random.split(key, 3)
    x = jax.random.normal(kx, (N, C, H, W), dtype=jnp.float32)
    # Deterministic synthetic conv params (shapes from Conv2d(C, C, 3, padding=1)).
    w = 0.1 * jax.random.normal(kw, (C, C, 3, 3), dtype=jnp.float32)
    b = 0.05 * jax.random.normal(kb, (C,), dtype=jnp.float32)

    out, lat = skip_module_forward(x, w, b)
    out = jax.block_until_ready(out)
    lat = jax.block_until_ready(lat)

    out_ref, lat_ref = _reference(x, w, b)
    assert out.shape == (N, C, H, W) and lat.shape == (N, C, H, W)
    assert jnp.allclose(out, out_ref, atol=1e-5, rtol=1e-5)
    assert jnp.allclose(lat, lat_ref, atol=1e-5, rtol=1e-5)

    print("KERNEL_OK")
</pallas_src>

<mosaic_0001>
module attributes {stable_mosaic.version = 11 : i64} {
  func.func @_skip_conv_kernel(%arg0: i32, %arg1: memref<1x36x256xf32, #tpu.memory_space<vmem>>, %arg2: memref<4x36xf32, #tpu.memory_space<vmem>>, %arg3: memref<4x1xf32, #tpu.memory_space<vmem>>, %arg4: memref<1x4x256xf32, #tpu.memory_space<vmem>>, %arg5: memref<1x4x256xf32, #tpu.memory_space<vmem>>) attributes {dimension_semantics = [#tpu.dimension_semantics<parallel>], iteration_bounds = array<i64: 2>, scalar_prefetch = 0 : i64, scratch_operands = 0 : i64, tpu.core_type = #tpu.core_type<tc>, window_params = [{transform_indices = @transform_0, window_bounds = array<i64: 1, 36, 256>}, {pipeline_mode = #tpu.pipeline_mode<synchronous>, transform_indices = @transform_1, window_bounds = array<i64: 4, 36>}, {pipeline_mode = #tpu.pipeline_mode<synchronous>, transform_indices = @transform_2, window_bounds = array<i64: 4, 1>}, {transform_indices = @transform_3, window_bounds = array<i64: 1, 4, 256>}, {transform_indices = @transform_4, window_bounds = array<i64: 1, 4, 256>}]} {
    %c0 = arith.constant 0 : index
    %c0_0 = arith.constant 0 : index
    %c0_1 = arith.constant 0 : index
    %0 = vector.load %arg1[%c0, %c0_0, %c0_1] : memref<1x36x256xf32, #tpu.memory_space<vmem>>, vector<1x36x256xf32>
    %1 = vector.shape_cast %0 : vector<1x36x256xf32> to vector<36x256xf32>
    %c0_2 = arith.constant 0 : index
    %c0_3 = arith.constant 0 : index
    %2 = vector.load %arg2[%c0_2, %c0_3] : memref<4x36xf32, #tpu.memory_space<vmem>>, vector<4x36xf32>
    %cst = arith.constant dense<0.000000e+00> : vector<4x256xf32>
    %3 = tpu.matmul %2, %1, %cst {dimension_numbers = #tpu.dot_dimension_numbers<[1], [0], [0], [1], [0, 0, 1, 1], [], []>} : vector<4x36xf32>, vector<36x256xf32>, vector<4x256xf32> -> vector<4x256xf32>
    %c0_4 = arith.constant 0 : index
    %c0_5 = arith.constant 0 : index
    %4 = vector.load %arg3[%c0_4, %c0_5] : memref<4x1xf32, #tpu.memory_space<vmem>>, vector<4x1xf32>
    %5 = vector.broadcast %4 : vector<4x1xf32> to vector<4x256xf32>
    %6 = arith.addf %3, %5 : vector<4x256xf32>
    %c0_6 = arith.constant 0 : index
    %c0_7 = arith.constant 0 : index
    %c0_8 = arith.constant 0 : index
    %7 = vector.load %arg5[%c0_6, %c0_7, %c0_8] : memref<1x4x256xf32, #tpu.memory_space<vmem>>, vector<1x4x256xf32>
    %8 = vector.shape_cast %7 : vector<1x4x256xf32> to vector<4x256xf32>
    %9 = vector.shape_cast %6 : vector<4x256xf32> to vector<1x4x256xf32>
    tpu.vector_store %arg5[%c0_6, %c0_7, %c0_8], %9 {strides = array<i32>} : memref<1x4x256xf32, #tpu.memory_space<vmem>>, vector<1x4x256xf32>,
    %10 = vector.extract_strided_slice %1 {offsets = [16, 0], sizes = [4, 256], strides = [1, 1]} : vector<36x256xf32> to vector<4x256xf32>
    %cst_9 = arith.constant 1.000000e-01 : f32
    %11 = vector.broadcast %cst_9 : f32 to vector<4x256xf32>
    %12 = arith.mulf %11, %10 : vector<4x256xf32>
    %13 = arith.addf %12, %6 : vector<4x256xf32>
    %c0_10 = arith.constant 0 : index
    %c0_11 = arith.constant 0 : index
    %c0_12 = arith.constant 0 : index
    %14 = vector.load %arg4[%c0_10, %c0_11, %c0_12] : memref<1x4x256xf32, #tpu.memory_space<vmem>>, vector<1x4x256xf32>
    %15 = vector.shape_cast %14 : vector<1x4x256xf32> to vector<4x256xf32>
    %16 = vector.shape_cast %13 : vector<4x256xf32> to vector<1x4x256xf32>
    tpu.vector_store %arg4[%c0_10, %c0_11, %c0_12], %16 {strides = array<i32>} : memref<1x4x256xf32, #tpu.memory_space<vmem>>, vector<1x4x256xf32>,
    return
  }
  func.func @transform_0(%arg0: i32) -> (i32, i32, i32) {
    %c0_i32 = arith.constant 0 : i32
    %c0_i32_0 = arith.constant 0 : i32
    %c0_i32_1 = arith.constant 0 : i32
    return %arg0, %c0_i32, %c0_i32_0 : i32, i32, i32
  }
  func.func @transform_1(%arg0: i32) -> (i32, i32) {
    %c0_i32 = arith.constant 0 : i32
    %c0_i32_0 = arith.constant 0 : i32
    %c0_i32_1 = arith.constant 0 : i32
    return %c0_i32, %c0_i32_0 : i32, i32
  }
  func.func @transform_2(%arg0: i32) -> (i32, i32) {
    %c0_i32 = arith.constant 0 : i32
    %c0_i32_0 = arith.constant 0 : i32
    %c0_i32_1 = arith.constant 0 : i32
    return %c0_i32, %c0_i32_0 : i32, i32
  }
  func.func @transform_3(%arg0: i32) -> (i32, i32, i32) {
    %c0_i32 = arith.constant 0 : i32
    %c0_i32_0 = arith.constant 0 : i32
    %c0_i32_1 = arith.constant 0 : i32
    return %arg0, %c0_i32, %c0_i32_0 : i32, i32, i32
  }
  func.func @transform_4(%arg0: i32) -> (i32, i32, i32) {
    %c0_i32 = arith.constant 0 : i32
    %c0_i32_0 = arith.constant 0 : i32
    %c0_i32_1 = arith.constant 0 : i32
    return %arg0, %c0_i32, %c0_i32_0 : i32, i32, i32
  }
}

</mosaic_0001>

<bundles_post_ra>
// kernel: tpu_custom_call.1
= control target key start
LH: loop header
LB: loop body
LE: loop exit
PB: predicated region body
PF: predicated region fallthrough
CT: control target
= control target key end

     0   :  { %10 = vsyncpa [#allocation3], 0  ;;  %s734_s0 = inlined_call_operand.vmem [shape: f32[2,36,256], index: 0, kind: input, shape index: {}]   ;;  %s735_s1 = inlined_call_operand.vmem [shape: f32[4,36], index: 1, kind: input, shape index: {}]   ;;  %s736_s2 = inlined_call_operand.vmem [shape: f32[4,1], index: 2, kind: input, shape index: {}]   ;;  %s737_s3 = inlined_call_operand.hbm [shape: f32[2,4,256], index: 3, kind: output, shape index: {0}]   ;;  %s738_s4 = inlined_call_operand.hbm [shape: f32[2,4,256], index: 4, kind: output, shape index: {1}]  }
   0x1   :  { %12 = vsyncpa [#allocation3 + $0x1], 0 }
   0x2   :  { %13 = vsyncpa [#allocation5], 0 }
   0x3   :  { %15 = vsyncpa [#allocation5 + $0x1], 0  ;;  %s610_s15 = smov 0   ;;  %s612_s16 = smov 0  }
   0x4   :  { %s614_s17 = smov 0   ;;  %s616_s18 = smov 0  }
   0x5 LB: > { %s631_s19 = sadd.s32 4294967295, %s582_s18   ;;  %s420_s20 = sadd.s32 4294967294, %s582_s18   ;;  %s582_s18 = sphi %s616_s18, %s744_s18   ;;  %s578_s17 = sphi %s614_s17, %s743_s17   ;;  %s574_s16 = sphi %s612_s16, %s742_s16   ;;  %s570_s15 = sphi %s610_s15, %s741_s15  }
   0x6   : > { %s635_s21 = sadd.s32 1, %s582_s18   ;;  %s96_s22 = sadd.s32 1, %s578_s17 }
   0x7   : > { %s93_s23 = ssub.s32 %s582_s18, %s635_s21  ;;  %p106_p0 = scmp.ne.s32.totalorder %s578_s17, %s574_s16 }
   0x8   : > { %p94_p1 = scmp.eq.s32.totalorder %s93_s23, 0  ;;  %p107_p2 = scmp.eq.s32.totalorder %s631_s19, 1 }
   0x9   : > { %p112_p3 = scmp.ne.s32.totalorder %s574_s16, %s570_s15  ;;  %p113_p4 = scmp.eq.s32.totalorder %s420_s20, 1 }
   0xa   : > { %s646_s24 = scalar_select %p94_p1, %s578_s17, %s96_s22  }
   0xb   : > { %p648_p5 = por %p107_p2, %p106_p0  ;;  %p652_p6 = por %p113_p4, %p112_p3 }
   0xc   : > { %p423_p7 = scmp.ge.s32.totalorder %s582_s18, 1  ;;  %p171_p8 = scmp.lt.s32.totalorder %s582_s18, 3 }
   0xe   : > { %p172_p9 = pnand %p423_p7, %p171_p8 }
   0xf   : > { %p202_p10 = scmp.lt.s32.totalorder (!%p172_p9), %s631_s19, 1  ;;  %s672_s10 = sand.u32 (!%p172_p9), 1, %s574_s16  }
  0x10   : > { %175 = sbr.rel (%p172_p9) target bundleno = 183 (0xb7), region = 32  ;;  %s424_s11 = sshll.u32 (!%p172_p9), %s672_s10, 3 }
  0x11   : > { %s439_s12 = sshll.u32 (!%p172_p9), %s631_s19, 3  ;;  %s201_s28 = scalar_lea.vmem (!%p172_p9), [#allocation4], %s424_s11 }
  0x12   : > { %s323_s20 = scalar_lea.hbm (!%p172_p9), %s738_s4, %s439_s12  ;;  %s308_s27 = scalar_lea.hbm (!%p172_p9), %s737_s3, %s439_s12 }
  0x13   : > { %s312_s6 = sshll.u32 (!%p172_p9), %s308_s27, 4  ;;  %s508_s13 = scalar_lea.hbm (!%p172_p9), %s738_s4, 16  ;;  %s688_s6 = int_to_ptr.hbm [resolvable:$true] %s312_s6 }
  0x15   : > { %v584_v0 = vmov 0   ;;  %v218_v1 = vld [vmem:[%s736_s2] sm:$0xf]  ;;  %s203_s29 = scalar_select %p202_p10, %s631_s19, 1  ;;  %vm228_vm0 = vcmask 1043456   ;;  %vm224_vm1 = vcmask 293888  }
  0x16   : > { %487 = vset.pattern.permute.xlu0 %v584_v0  ;;  %v217_v12 = vld [vmem:[%s735_s1] sm:$0xf]  ;;  %s682_s19 = scalar_lea.vmem [#allocation2], %s424_s11 }
  0x17   : > { %221 = vperm.xlu0 %487, %v218_v1   ;;  %s441_s30 = smul.u32 80, %s203_s29  ;;  %s325_s29 = sshll.u32 %s201_s28, 4  ;;  %s326_s29 = int_to_ptr.vmem [resolvable:$true] %s325_s29 }
  0x18   : > { %s310_s5 = sshll.u32 %s682_s19, 4  ;;  %s686_s5 = int_to_ptr.vmem [resolvable:$true] %s310_s5 }
  0x19   : > { %s206_s7 = scalar_lea.vmem %s734_s0, %s441_s30  ;;  %s327_s30 = sshll.u32 %s323_s20, 4  ;;  %s328_s30 = int_to_ptr.hbm [resolvable:$true] %s327_s30 }
  0x1a   : > { %v215_v2 = vld [vmem:[%s206_s7 + $0x40] sm:$0xf]  ;;  %v216_v3 = vld [vmem:[%s206_s7 + $0x48] sm:$0xf]  ;;  %v213_v4 = vld [vmem:[%s206_s7 + $0x30] sm:$0xff]  ;;  %s502_s8 = sshra.s32 %s328_s30, 4  ;;  %s503_s8 = int_to_ptr.hbm [resolvable:$true] %s502_s8 }
  0x1b   : > { %427 = vmatpush.msk.msra.mxu0 %vm228_vm0, %v215_v2  ;;  %429 = vmatpush.msk.msra.mxu1 %vm228_vm0, %v216_v3  ;;  %v214_v5 = vld [vmem:[%s206_s7 + $0x38] sm:$0xff]  ;;  %v211_v6 = vld [vmem:[%s206_s7 + $0x20] sm:$0xff]  ;;  %v212_v7 = vld [vmem:[%s206_s7 + $0x28] sm:$0xff]  ;;  %s504_s9 = scalar_lea.hbm %s503_s8, 8  ;;  %p509_p0 = scmp.lt.s32.totalorder %s503_s8, %s738_s4 }
  0x1c   : > { %v209_v8 = vld [vmem:[%s206_s7 + $0x10] sm:$0xff]  ;;  %v210_v9 = vld [vmem:[%s206_s7 + $0x18] sm:$0xff]  ;;  %v207_v10 = vld [vmem:[%s206_s7] sm:$0xff]  ;;  %v282_v14 = vmul.f32 0.1, %v212_v7  ;;  %p505_p11 = scmp.ne.s32.totalorder %s503_s8, %s504_s9  ;;  %p510_p1 = scmp.lt.s32.totalorder %s508_s13, %s504_s9 }
  0x1d   : > { %247 = vmatpush.msra.mxu0 %v213_v4  ;;  %267 = vmatpush.msra.mxu1 %v214_v5  ;;  %v208_v11 = vld [vmem:[%s206_s7 + $0x8] sm:$0xff]  ;;  %v281_v17 = vmul.f32 0.1, %v211_v6  ;;  %s297_s7 = scalar_lea.sflag [#allocation5], %s672_s10 }
  0x1e   : > { %p506_p12 = pnand %p505_p11, %p648_p5  ;;  %p511_p2 = por %p510_p1, %p509_p0 }
  0x1f   : > { %248 = vmatpush.msra.mxu0 %v211_v6  ;;  %268 = vmatpush.msra.mxu1 %v212_v7 }
  0x20   : > { %p507_p13 = pneg %p506_p12 }
  0x21   : > { %249 = vmatpush.msra.mxu0 %v209_v8  ;;  %269 = vmatpush.msra.mxu1 %v210_v9 }
  0x22   : > { %p512_p3 = pnand %p511_p2, %p507_p13 }
  0x23   : > { %250 = vmatpush.msra.mxu0 %v207_v10  ;;  %270 = vmatpush.msra.mxu1 %v208_v11 }
  0x24   : > { %428 = vmatmul.msk.f32.vlgmr.msra.gmra.mxu0 %vm224_vm1, %v217_v12  ;;  %430 = vmatmul.msk.f32.vlgmr.msra.gmra.mxu1 %vm224_vm1, %v217_v12 }
  0x89   : > { %v222_v13 = vpop.permute.xlu0 %221 }
  0xa1   : > { %v252_v15 = vpop.f32.mrf.mxu0  ;;  %v272_v16 = vpop.f32.mrf.mxu1 }
  0xa2   : > { %v253_v18 = vadd.f32 %v252_v15, %v222_v13  ;;  %v273_v19 = vadd.f32 %v272_v16, %v222_v13 }
  0xa4   : > { %v277_v20 = vrot.slane %v273_v19, 4  ;;  %v284_v21 = vadd.f32 %v282_v14, %v273_v19  ;;  %v283_v22 = vadd.f32 %v281_v17, %v253_v18 }
  0xa6   : > { %v287_v23 = vrot.slane %v284_v21, 4  ;;  %v278_v24 = vsel %vm228_vm0, %v253_v18, %v277_v20 }
  0xa7   : > { %280 = vst [vmem:[%s201_s28] sm:$0xff] %v278_v24 }
  0xa8   : > { %v288_v25 = vsel %vm228_vm0, %v283_v22, %v287_v23 }
  0xa9   : > { %515 = shalt.err (!%p512_p3)
}
  0xaa   : > { %443 = dma.vmem_to_hbm [thread:$0]  (%p648_p5), %s326_s29, 128, %s328_s30, %s297_s7   ;;  %290 = vst [vmem:[%s682_s19] sm:$0xff] %v288_v25 }
  0xab   : > { %s292_s22 = scalar_lea.sflag [#allocation3], %s672_s10  ;;  %s530_s23 = sshra.s32 %s688_s6, 4  ;;  %s531_s23 = int_to_ptr.hbm [resolvable:$true] %s530_s23 }
  0xac   : > { %s532_s27 = scalar_lea.hbm %s531_s23, 8  ;;  %s536_s9 = scalar_lea.hbm %s737_s3, 16 }
  0xad   : > { %p533_p4 = scmp.ne.s32.totalorder %s531_s23, %s532_s27  ;;  %p537_p9 = scmp.lt.s32.totalorder %s531_s23, %s737_s3 }
  0xae   : > { %p538_p10 = scmp.lt.s32.totalorder %s536_s9, %s532_s27 }
  0xaf   : > { %p534_p7 = pnand %p533_p4, %p648_p5 }
  0xb0   : > { %p539_p11 = por %p538_p10, %p537_p9 }
  0xb1   : > { %p535_p8 = pneg %p534_p7 }
  0xb3   : > { %p540_p12 = pnand %p539_p11, %p535_p8 }
  0xb5   : > { %543 = shalt.err (!%p540_p12)
}
  0xb6   : > { %442 = dma.vmem_to_hbm [thread:$0]  (%p648_p5), %s686_s5, 128, %s688_s6, %s292_s22  }
  0xb7 PF: > { %p453_p13 = scmp.ge.s32.totalorder %s582_s18, 2  ;;  %s339_s10 = sand.u32 1, %s570_s15  }
  0xb8   : > { %s340_s29 = scalar_lea.sflag [#allocation3], %s339_s10 }
  0xb9   : > { %p447_p0 = pnand %p453_p13, %p652_p6 }
  0xbb   : > { %p448_p1 = pneg %p447_p0 }
  0xbd   : > { %561 = dma.done.wait (%p448_p1), %s340_s29, 128  }
  0xbe   : > { %563 = vsyncadd (%p448_p1), %s340_s29, 4294967168  ;;  %s350_s30 = scalar_lea.sflag [#allocation5], %s339_s10 }
  0xbf   : > { %565 = dma.done.wait (%p448_p1), %s350_s30, 128  }
  0xc0   : > { %567 = vsyncadd (%p448_p1), %s350_s30, 4294967168  ;;  %p18_p5 = scmp.ge.s32.totalorder %s635_s21, 4   ;;  %s741_s15 = smov %s574_s16 }
  0xc1   : > { %s742_s16 = smov %s578_s17  ;;  %s743_s17 = smov %s646_s24 }
  0xc2   : > { %s744_s18 = smov %s635_s21  ;;  %20 = sbr.rel (!%p18_p5) target bundleno = 5 (0x5), region = 84 }
  0xc7   :  { %356 = vsyncpa [#allocation3], 1 }
  0xc8   :  { %358 = vsyncpa [#allocation3 + $0x1], 1 }
  0xc9   :  { %359 = vsyncpa [#allocation5], 1 }
  0xca   :  { %361 = vsyncpa [#allocation5 + $0x1], 1 }

</bundles_post_ra>
